<compile_context>
chip_gen: v7x
topology: tpu7x:2x2x1
jax: 0.10.0
libtpu: 0.0.40
codegen_flags: <defaults>
</compile_context>

<pallas_src>
import functools

import jax
import jax.numpy as jnp
from jax.experimental import pallas as pl
from jax.experimental.pallas import tpu as pltpu


def _vmem_capacity_bytes():
    """Per-core VMEM capacity; conservative fallbacks if the query fails."""
    try:
        cap = getattr(pltpu.get_tpu_info(), "vmem_capacity_bytes", None)
        if cap:
            return int(cap)
    except Exception:
        pass
    try:
        kind = jax.devices()[0].device_kind.lower()
        if "v7" in kind:
            return 64 << 20
    except Exception:
        pass
    return 128 << 20  # v5e / v6e


def _default_num_slices():
    """2 parallel slices only on chips with 2 TensorCores (v7x / v4-class)."""
    try:
        kind = jax.devices()[0].device_kind.lower()
    except Exception:
        return 1
    if "v7" in kind or "v4" in kind or "v5p" in kind:
        return 2
    return 1


def _bce_smooth_kernel(x_ref, t_ref, out_ref, acc_ref, *, confidence, smooth,
                       block_rows, acc_rows, nblocks, blocks_per_slice,
                       valid_rows_last, has_extra):
    c = pl.program_id(0)            # per-core slice ("parallel")
    i = pl.program_id(1)            # streaming reduction steps ("arbitrary")
    g = c * blocks_per_slice + i    # global row-block index

    @pl.when(i == 0)
    def _():
        acc_ref[...] = jnp.zeros_like(acc_ref)

    x = x_ref[...].astype(jnp.float32)
    t = t_ref[...].astype(jnp.float32)

    # Label smoothing (the torch.no_grad branch of the module).
    true_dist = t * confidence + 0.5 * smooth
    # Numerically stable BCE-with-logits: max(x,0) - x*z + log1p(exp(-|x|)).
    loss = jnp.maximum(x, 0.0) - x * true_dist + jnp.log1p(jnp.exp(-jnp.abs(x)))

    def accumulate(vals):
        # Reduce the row-block onto the (acc_rows, F) accumulator with plain
        # vreg-wise adds over sublane-tile groups (no cross-sublane reduce
        # per step); the final 8->1 + lane reduce happens in the wrapper.
        if block_rows == acc_rows:
            acc_ref[...] += vals
        else:
            acc_ref[...] += jnp.sum(
                vals.reshape(block_rows // acc_rows, acc_rows, vals.shape[-1]),
                axis=0)

    ragged = valid_rows_last != block_rows          # python-static
    if not ragged and not has_extra:
        accumulate(loss)                            # fast path: never masks
    else:
        not_tail = g != (nblocks - 1)
        if has_extra:
            # Duplicate block fetched by the clamped index_map (only when the
            # 2-way slice split doesn't divide nblocks): contribute nothing.
            not_tail = jnp.logical_and(not_tail, g < nblocks)

        @pl.when(not_tail)
        def _():
            accumulate(loss)

        @pl.when(g == nblocks - 1)
        def _():
            if ragged:
                # Only the single ragged tail block pays for the mask; the
                # bound is block-local so no large flat-index arithmetic.
                rows = jax.lax.broadcasted_iota(jnp.int32, loss.shape, 0)
                accumulate(jnp.where(rows < valid_rows_last, loss, 0.0))
            else:
                accumulate(loss)

    @pl.when(i == pl.num_programs(1) - 1)
    def _():
        out_ref[...] = acc_ref[...].reshape(out_ref.shape)


def bce_with_logits_smooth(inputs, targets, *, smooth=0.0, num_slices=None,
                           target_block_bytes=8 << 20):
    """Pallas implementation of BCEwLogitsSmooth.forward (scalar mean loss)."""
    assert inputs.shape == targets.shape
    total = int(inputs.size)

    # Natural minor dim is the lane axis; collapse the leading dims.  No
    # padding / copies of the big operands are made on the host side.
    F = inputs.shape[-1] if inputs.ndim >= 2 else inputs.shape[0]
    x2 = inputs.reshape(-1, F)
    t2 = targets.reshape(-1, F)
    R = x2.shape[0]

    # ---- generation-aware sizing -----------------------------------------
    vmem_cap = _vmem_capacity_bytes()
    vmem_limit = max(16 << 20, (vmem_cap * 3) // 4)   # ~96 MiB v5e/v6e, ~48 MiB v7x

    # Budget: 2x double-buffered inputs + ~6 live f32 block-sized temporaries.
    bytes_per_elem = x2.dtype.itemsize + t2.dtype.itemsize
    per_elem_budget = 2 * bytes_per_elem + 6 * 4
    max_block_elems = max(8 * F, (vmem_limit - (4 << 20)) // per_elem_budget)
    target_block_elems = int(min(target_block_bytes // 4, max_block_elems))

    target_rows = max(1, target_block_elems // F)
    if target_rows >= R:
        block_rows = R                       # single full-extent block
    else:
        block_rows = max(8, (target_rows // 8) * 8)
        if block_rows >= 64:                 # friendly sublane tiling for
            block_rows = (block_rows // 64) * 64   # bf16 / int8 targets too

    nblocks = pl.cdiv(R, block_rows)
    valid_rows_last = R - (nblocks - 1) * block_rows

    C = num_slices if num_slices is not None else _default_num_slices()
    C = max(1, min(C, nblocks))
    blocks_per_slice = pl.cdiv(nblocks, C)
    has_extra = C * blocks_per_slice != nblocks

    acc_rows = 8 if block_rows % 8 == 0 else block_rows

    if has_extra:
        def in_idx(c, i):
            return (jnp.minimum(c * blocks_per_slice + i, nblocks - 1), 0)
    else:
        def in_idx(c, i):
            return (c * blocks_per_slice + i, 0)

    kernel = functools.partial(
        _bce_smooth_kernel,
        confidence=1.0 - smooth,
        smooth=smooth,
        block_rows=block_rows,
        acc_rows=acc_rows,
        nblocks=nblocks,
        blocks_per_slice=blocks_per_slice,
        valid_rows_last=valid_rows_last,
        has_extra=has_extra,
    )

    partials = pl.pallas_call(
        kernel,
        out_shape=jax.ShapeDtypeStruct((C, acc_rows, F), jnp.float32),
        grid_spec=pltpu.PrefetchScalarGridSpec(
            num_scalar_prefetch=0,
            grid=(C, blocks_per_slice),
            in_specs=[
                pl.BlockSpec((block_rows, F), in_idx),
                pl.BlockSpec((block_rows, F), in_idx),
            ],
            # Each parallel slice owns its own output block -> no cross-core race.
            out_specs=pl.BlockSpec((1, acc_rows, F), lambda c, i: (c, 0, 0)),
            scratch_shapes=[pltpu.VMEM((acc_rows, F), jnp.float32)],
        ),
        compiler_params=pltpu.CompilerParams(
            dimension_semantics=("parallel", "arbitrary"),
            vmem_limit_bytes=int(vmem_limit),
        ),
    )(x2, t2)

    # Tiny final reduce (C * acc_rows * F f32 values) + mean normalization.
    return jnp.sum(partials) / jnp.float32(total)


def _reference(inputs, targets, smooth=0.0):
    confidence = 1.0 - smooth
    x = inputs.astype(jnp.float32)
    z = targets.astype(jnp.float32) * confidence + 0.5 * smooth
    loss = jnp.maximum(x, 0.0) - x * z + jnp.log1p(jnp.exp(-jnp.abs(x)))
    return jnp.mean(loss)


if __name__ == "__main__":
    key = jax.random.PRNGKey(0)
    k1, k2 = jax.random.split(key)

    batch, features = 16, 128
    smooth = 0.1

    logits = jax.random.normal(k1, (batch, features), dtype=jnp.float32)
    # 0/1 targets passed as int8 (exactly representable) to cut HBM traffic;
    # upcast to f32 happens in-kernel.
    targets = (jax.random.uniform(k2, (batch, features)) > 0.5).astype(jnp.int8)

    out = bce_with_logits_smooth(logits, targets, smooth=smooth)
    out = jax.block_until_ready(out)

    ref = _reference(logits, targets, smooth=smooth)
    assert jnp.allclose(out, ref, atol=1e-5, rtol=1e-5), (out, ref)

    print("KERNEL_OK")
</pallas_src>

<mosaic_0001>
module attributes {stable_mosaic.version = 11 : i64} {
  func.func @_bce_smooth_kernel(%arg0: i32, %arg1: i32, %arg2: memref<16x128xf32, #tpu.memory_space<vmem>>, %arg3: memref<16x128xi8, #tpu.memory_space<vmem>>, %arg4: memref<1x8x128xf32, #tpu.memory_space<vmem>>, %arg5: memref<8x128xf32, #tpu.memory_space<vmem>>) attributes {dimension_semantics = [#tpu.dimension_semantics<parallel>, #tpu.dimension_semantics<arbitrary>], iteration_bounds = array<i64: 1, 1>, scalar_prefetch = 0 : i64, scratch_operands = 1 : i64, tpu.core_type = #tpu.core_type<tc>, window_params = [{transform_indices = @transform_0, window_bounds = array<i64: 16, 128>}, {transform_indices = @transform_1, window_bounds = array<i64: 16, 128>}, {transform_indices = @transform_2, window_bounds = array<i64: 1, 8, 128>}]} {
    %c0_i32 = arith.constant 0 : i32
    %0 = arith.cmpi eq, %arg1, %c0_i32 : i32
    %1 = arith.extui %0 : i1 to i32
    %c0_i32_0 = arith.constant 0 : i32
    %2 = arith.cmpi ne, %1, %c0_i32_0 : i32
    scf.if %2 {
      %cst_14 = arith.constant 0.000000e+00 : f32
      %28 = vector.broadcast %cst_14 : f32 to vector<8x128xf32>
      %c0_15 = arith.constant 0 : index
      %c0_16 = arith.constant 0 : index
      %29 = vector.load %arg5[%c0_15, %c0_16] : memref<8x128xf32, #tpu.memory_space<vmem>>, vector<8x128xf32>
      tpu.vector_store %arg5[%c0_15, %c0_16], %28 {strides = array<i32>} : memref<8x128xf32, #tpu.memory_space<vmem>>, vector<8x128xf32>,
    } else {
    }
    %c0 = arith.constant 0 : index
    %c0_1 = arith.constant 0 : index
    %3 = vector.load %arg2[%c0, %c0_1] : memref<16x128xf32, #tpu.memory_space<vmem>>, vector<16x128xf32>
    %c0_2 = arith.constant 0 : index
    %c0_3 = arith.constant 0 : index
    %4 = vector.load %arg3[%c0_2, %c0_3] : memref<16x128xi8, #tpu.memory_space<vmem>>, vector<16x128xi8>
    %5 = arith.sitofp %4 : vector<16x128xi8> to vector<16x128xf32>
    %cst = arith.constant 0.899999976 : f32
    %6 = vector.broadcast %cst : f32 to vector<16x128xf32>
    %7 = arith.mulf %5, %6 : vector<16x128xf32>
    %cst_4 = arith.constant 5.000000e-02 : f32
    %8 = vector.broadcast %cst_4 : f32 to vector<16x128xf32>
    %9 = arith.addf %7, %8 : vector<16x128xf32>
    %cst_5 = arith.constant 0.000000e+00 : f32
    %10 = vector.broadcast %cst_5 : f32 to vector<16x128xf32>
    %11 = arith.maximumf %3, %10 : vector<16x128xf32>
    %12 = arith.mulf %3, %9 : vector<16x128xf32>
    %13 = arith.subf %11, %12 : vector<16x128xf32>
    %14 = math.absf %3 : vector<16x128xf32>
    %cst_6 = arith.constant 0.000000e+00 : f32
    %15 = vector.broadcast %cst_6 : f32 to vector<16x128xf32>
    %16 = arith.subf %15, %14 : vector<16x128xf32>
    %17 = math.exp %16 : vector<16x128xf32>
    %18 = math.log1p %17 : vector<16x128xf32>
    %19 = arith.addf %13, %18 : vector<16x128xf32>
    %c0_7 = arith.constant 0 : index
    %c0_8 = arith.constant 0 : index
    %20 = vector.load %arg5[%c0_7, %c0_8] : memref<8x128xf32, #tpu.memory_space<vmem>>, vector<8x128xf32>
    %21 = vector.shape_cast %19 : vector<16x128xf32> to vector<2x8x128xf32>
    %cst_9 = arith.constant dense<0.000000e+00> : vector<8x128xf32>
    %22 = vector.multi_reduction <add>, %21, %cst_9 [0] : vector<2x8x128xf32> to vector<8x128xf32>
    %23 = arith.addf %20, %22 : vector<8x128xf32>
    %c0_10 = arith.constant 0 : index
    %c0_11 = arith.constant 0 : index
    %24 = vector.load %arg5[%c0_10, %c0_11] : memref<8x128xf32, #tpu.memory_space<vmem>>, vector<8x128xf32>
    tpu.vector_store %arg5[%c0_10, %c0_11], %23 {strides = array<i32>} : memref<8x128xf32, #tpu.memory_space<vmem>>, vector<8x128xf32>,
    %c0_i32_12 = arith.constant 0 : i32
    %25 = arith.cmpi eq, %arg1, %c0_i32_12 : i32
    %26 = arith.extui %25 : i1 to i32
    %c0_i32_13 = arith.constant 0 : i32
    %27 = arith.cmpi ne, %26, %c0_i32_13 : i32
    scf.if %27 {
      %c0_14 = arith.constant 0 : index
      %c0_15 = arith.constant 0 : index
      %28 = vector.load %arg5[%c0_14, %c0_15] : memref<8x128xf32, #tpu.memory_space<vmem>>, vector<8x128xf32>
      %29 = vector.shape_cast %28 : vector<8x128xf32> to vector<1x8x128xf32>
      %c0_16 = arith.constant 0 : index
      %c0_17 = arith.constant 0 : index
      %c0_18 = arith.constant 0 : index
      %30 = vector.load %arg4[%c0_16, %c0_17, %c0_18] : memref<1x8x128xf32, #tpu.memory_space<vmem>>, vector<1x8x128xf32>
      tpu.vector_store %arg4[%c0_16, %c0_17, %c0_18], %29 {strides = array<i32>} : memref<1x8x128xf32, #tpu.memory_space<vmem>>, vector<1x8x128xf32>,
    } else {
    }
    return
  }
  func.func @transform_0(%arg0: i32, %arg1: i32) -> (i32, i32) {
    %c1_i32 = arith.constant 1 : i32
    %0 = arith.muli %arg0, %c1_i32 : i32
    %1 = arith.addi %0, %arg1 : i32
    %c0_i32 = arith.constant 0 : i32
    %c0_i32_0 = arith.constant 0 : i32
    return %1, %c0_i32 : i32, i32
  }
  func.func @transform_1(%arg0: i32, %arg1: i32) -> (i32, i32) {
    %c1_i32 = arith.constant 1 : i32
    %0 = arith.muli %arg0, %c1_i32 : i32
    %1 = arith.addi %0, %arg1 : i32
    %c0_i32 = arith.constant 0 : i32
    %c0_i32_0 = arith.constant 0 : i32
    return %1, %c0_i32 : i32, i32
  }
  func.func @transform_2(%arg0: i32, %arg1: i32) -> (i32, i32, i32) {
    %c0_i32 = arith.constant 0 : i32
    %c0_i32_0 = arith.constant 0 : i32
    %c0_i32_1 = arith.constant 0 : i32
    return %arg0, %c0_i32, %c0_i32_0 : i32, i32, i32
  }
}

</mosaic_0001>

<bundles_post_ra>
// kernel: tpu_custom_call.1
= control target key start
LH: loop header
LB: loop body
LE: loop exit
PB: predicated region body
PF: predicated region fallthrough
CT: control target
= control target key end

     0   :  { %7 = vsyncpa [#allocation4], 0  ;;  %s277_s0 = inlined_call_operand.hbm [shape: f32[16,128], index: 0, kind: input, shape index: {}]   ;;  %s278_s1 = inlined_call_operand.hbm [shape: s8[16,128], index: 1, kind: input, shape index: {}]   ;;  %s279_s2 = inlined_call_operand.hbm [shape: f32[1,8,128], index: 2, kind: output, shape index: {}]  }
   0x1   :  { %8 = vsyncpa [#allocation7], 0 }
   0x2   :  { %9 = vsyncpa [#allocation5], 0  ;;  %s219_s9 = smov [#allocation3]   ;;  %s147_s13 = scalar_lea.hbm %s277_s0, 256 }
   0x3   :  { %s19_s10 = sshll.u32 %s219_s9, 4  ;;  %p148_p0 = scmp.ne.s32.totalorder %s277_s0, %s147_s13  ;;  %s20_s10 = int_to_ptr.vmem [resolvable:$true] %s19_s10 }
   0x4   :  { %p151_p1 = scmp.lt.u32.totalorder %s147_s13, %s277_s0 }
   0x6   :  { %p153_p2 = pnand %p151_p1, %p148_p0 }
   0x8   :  { %156 = shalt.err (!%p153_p2)
}
   0x9   :  { %s157_s18 = scalar_lea.vmem %s20_s10, 256  ;;  %p162_p4 = scmp.lt.s32.totalorder %s20_s10, %s20_s10 }
   0xa   :  { %p158_p3 = scmp.ne.s32.totalorder %s20_s10, %s157_s18  ;;  %p163_p5 = scmp.lt.s32.totalorder %s157_s18, %s157_s18 }
   0xc   :  { %p164_p6 = por %p163_p5, %p162_p4 }
   0xe   :  { %p165_p7 = pnand %p164_p6, %p158_p3 }
  0x10   :  { %168 = shalt.err (!%p165_p7)
}
  0x11   :  { %s220_s19 = smov 128   ;;  %s221_s20 = smov 8  }
  0x12   :  { %25 = dma.hbm_to_vmem [thread:$0]  %s277_s0, 256, %s20_s10, [#allocation4], %s220_s19, %s220_s19, %s221_s20  }
  0x13   :  { %s222_s23 = smov [#allocation6]   ;;  %s169_s27 = scalar_lea.hbm %s278_s1, 64 }
  0x14   :  { %s35_s24 = sshll.u32 %s222_s23, 4  ;;  %p170_p8 = scmp.ne.s32.totalorder %s278_s1, %s169_s27  ;;  %s36_s24 = int_to_ptr.vmem [resolvable:$true] %s35_s24 }
  0x15   :  { %p173_p9 = scmp.lt.u32.totalorder %s169_s27, %s278_s1 }
  0x17   :  { %p175_p10 = pnand %p173_p9, %p170_p8 }
  0x19   :  { %178 = shalt.err (!%p175_p10)
}
  0x1a   :  { %s179_s4 = scalar_lea.vmem %s36_s24, 64  ;;  %p184_p12 = scmp.lt.s32.totalorder %s36_s24, %s36_s24 }
  0x1b   :  { %p180_p11 = scmp.ne.s32.totalorder %s36_s24, %s179_s4  ;;  %p185_p13 = scmp.lt.s32.totalorder %s179_s4, %s179_s4 }
  0x1d   :  { %p186_p0 = por %p185_p13, %p184_p12 }
  0x1f   :  { %p187_p1 = pnand %p186_p0, %p180_p11 }
  0x21   :  { %190 = shalt.err (!%p187_p1)
}
  0x22   :  { %s223_s0 = smov 32   ;;  %s224_s5 = smov 2  }
  0x23   :  { %41 = dma.hbm_to_vmem [thread:$0]  %s278_s1, 64, %s36_s24, [#allocation7], %s223_s0, %s223_s0, %s224_s5  }
  0x24   :  { %213 = dma.done.wait [#allocation4], 256  }
  0x25   :  { %214 = vsyncadd [#allocation4], 4294967040 }
  0x26   :  { %215 = dma.done.wait [#allocation7], 64  }
  0x27   :  { %216 = vsyncadd [#allocation7], 4294967232  ;;  %v57_v0 = vld [vmem:[#allocation3] sm:$0xff]  ;;  %v58_v1 = vld [vmem:[#allocation3 + $0x8] sm:$0xff]  ;;  %s225_s1 = smov [#allocation8]  }
  0x28   :  { %v75_v2 = vand.u32 2147483647, %v57_v0  ;;  %v76_v3 = vand.u32 2147483647, %v58_v1  ;;  %v129_v8 = vld [vmem:[#allocation6] sm:$0xf]  }
  0x29   :  { %v130_v9 = vunpack.c.0.s8 %v129_v8  ;;  %v131_v10 = vunpack.c.1.s8 %v129_v8  ;;  %v69_v24 = vmax.f32 %v57_v0, 0.0  ;;  %v70_v28 = vmax.f32 %v58_v1, 0.0  ;;  %s118_s8 = sshll.u32 %s225_s1, 4  ;;  %s119_s8 = int_to_ptr.vmem [resolvable:$true] %s118_s8 }
  0x2a   :  { %v77_v4 = vsub.f32 0.0, %v75_v2  ;;  %v78_v5 = vsub.f32 0.0, %v76_v3  ;;  %s191_s9 = scalar_lea.vmem %s119_s8, 128  ;;  %p196_p3 = scmp.lt.s32.totalorder %s119_s8, %s119_s8 }
  0x2b   :  { %v63_v11 = vcvt.s32.f32 %v130_v9  ;;  %v64_v12 = vcvt.s32.f32 %v131_v10  ;;  %p192_p2 = scmp.ne.s32.totalorder %s119_s8, %s191_s9  ;;  %p197_p4 = scmp.lt.s32.totalorder %s191_s9, %s191_s9 }
  0x2c   :  { %v79_v6 = vmul.f32 1.442695, %v77_v4  ;;  %v81_v7 = vmul.f32 1.442695, %v78_v5 }
  0x2d   :  { %v65_v15 = vmul.f32 0.9, %v63_v11  ;;  %v66_v17 = vmul.f32 0.9, %v64_v12  ;;  %p198_p5 = por %p197_p4, %p196_p3 }
  0x2e   :  { %139 = vpow2.f32 %v79_v6 }
  0x2f   :  { %141 = vpow2.f32 %v81_v7  ;;  %v67_v20 = vadd.f32 0.05, %v65_v15  ;;  %v68_v22 = vadd.f32 0.05, %v66_v17  ;;  %p199_p6 = pnand %p198_p5, %p192_p2 }
  0x31   :  { %v71_v25 = vmul.f32 %v67_v20, %v57_v0  ;;  %v72_v29 = vmul.f32 %v68_v22, %v58_v1 }
  0x33   :  { %v73_v33 = vsub.f32 %v69_v24, %v71_v25  ;;  %v74_v36 = vsub.f32 %v70_v28, %v72_v29 }
  0x38   :  { %v140_v13 = vpop.eup %139 }
  0x39   :  { %v142_v14 = vpop.eup %141  ;;  %v83_v16 = vadd.f32 1.0, %v140_v13  ;;  %v86_v19 = vmul.f32 -0.5, %v140_v13  ;;  %v89_v26 = vand.u32 2147483647, %v140_v13 }
  0x3a   :  { %v92_v18 = vadd.f32 1.0, %v142_v14  ;;  %v95_v21 = vmul.f32 -0.5, %v142_v14  ;;  %v98_v30 = vand.u32 2147483647, %v142_v14 }
  0x3b   :  { %143 = vlog2.f32 %v83_v16  ;;  %v87_v23 = vadd.f32 1.0, %v86_v19  ;;  %vm90_vm0 = vcmp.lt.f32.partialorder %v89_v26, 0.0004427343 }
  0x3c   :  { %145 = vlog2.f32 %v92_v18  ;;  %v96_v27 = vadd.f32 1.0, %v95_v21  ;;  %vm99_vm1 = vcmp.lt.f32.partialorder %v98_v30, 0.0004427343 }
  0x3d   :  { %v88_v31 = vmul.f32 %v140_v13, %v87_v23 }
  0x3e   :  { %v97_v34 = vmul.f32 %v142_v14, %v96_v27 }
  0x45   :  { %v144_v32 = vpop.eup %143 }
  0x46   :  { %v146_v35 = vpop.eup %145  ;;  %v85_v37 = vmul.f32 0.6931472, %v144_v32 }
  0x47   :  { %v94_v38 = vmul.f32 0.6931472, %v146_v35 }
  0x48   :  { %v91_v39 = vsel %vm90_vm0, %v88_v31, %v85_v37 }
  0x49   :  { %v100_v40 = vsel %vm99_vm1, %v97_v34, %v94_v38  ;;  %v101_v41 = vadd.f32 %v91_v39, %v73_v33 }
  0x4a   :  { %v102_v42 = vadd.f32 %v100_v40, %v74_v36 }
  0x4c   :  { %v104_v43 = vadd.f32 %v102_v42, %v101_v41 }
  0x4e   :  { %111 = vst [vmem:[#allocation8] sm:$0xff] %v104_v43 }
  0x4f   :  { %202 = shalt.err (!%p199_p6)
}
  0x50   :  { %s203_s12 = scalar_lea.hbm %s279_s2, 128 }
  0x51   :  { %p204_p7 = scmp.ne.s32.totalorder %s279_s2, %s203_s12  ;;  %p207_p8 = scmp.lt.u32.totalorder %s203_s12, %s279_s2 }
  0x53   :  { %p209_p9 = pnand %p207_p8, %p204_p7 }
  0x55   :  { %212 = shalt.err (!%p209_p9)
}
  0x56   :  { %121 = dma.vmem_to_hbm [thread:$0]  %s119_s8, 128, %s279_s2, [#allocation5]  }
  0x57   :  { %217 = dma.done.wait [#allocation5], 128  }
  0x58   :  { %218 = vsyncadd [#allocation5], 4294967168 }
  0x59   :  { %125 = vsyncpa [#allocation4], 1 }
  0x5a   :  { %126 = vsyncpa [#allocation7], 1 }
  0x5b   :  { %127 = vsyncpa [#allocation5], 1 }

</bundles_post_ra>
